<compile_context>
chip_gen: v7x
topology: tpu7x:2x2x1
jax: 0.10.0
libtpu: 0.0.40
codegen_flags: <defaults>
</compile_context>

<pallas_src>
import jax
import jax.numpy as jnp
from jax.experimental import pallas as pl
from jax.experimental.pallas import tpu as pltpu

D_MODEL   = 32      # small d_model for the demo
POL_OUT   = 65      # pol_output_dim (module default)
VAL_OUT   = 1       # val_output_dim (module default)
BOARD_LEN = 64      # max_board_len (module default)
LANES     = 128     # padded lane width for the fused head
VAL_LANE  = POL_OUT # lane that carries the value head (65)
TB_CAP    = 128     # max boards per grid step (M = TB*64 rows per MXU matmul)


# ---------------------------------------------------------------------------
# Fused kernel: both heads, both layers, for TB boards per grid step.
#   h    = relu([x] @ [wp1|wv1|0] + [bp1|bv1|0])            (TB*64, 128)  MXU
#   c0   = sum_c h3 * D0   (upper band of the raw view)     (TB, 64)      VPU+XLU
#   c1   = sum_c h3 * D1   (lower band of the raw view)     (TB, 64)      VPU+XLU
#   cv   = sum_c h3 * DV   (value lane * wv2[s])            (TB, 64)      VPU+XLU
#   out  = [c0|c1|cv] @ S + b2       (single placement dot) (TB, 128)     MXU
#   out[:, 0:65] = policy logits ; out[:, 65] = tanh(value) ; rest = 0
# ---------------------------------------------------------------------------
def _fused_head_kernel(x_ref, w1_ref, b1_ref, bands_ref, s_ref, rows2_ref,
                       out_ref):
    tb = out_ref.shape[0]                                  # static

    # ---- stage 1: one big lane-dense matmul + bias + relu -----------------
    h = jnp.dot(x_ref[...], w1_ref[...], preferred_element_type=jnp.float32)
    h = jnp.maximum(h + b1_ref[...], 0.0)                  # (TB*64, 128)
    h3 = h.reshape(tb, BOARD_LEN, LANES)                   # leading-dim split only

    # ---- stage 2: banded contractions (VPU multiply + lane reduce) --------
    c0 = jnp.sum(h3 * bands_ref[0:BOARD_LEN, :], axis=-1)                  # (TB, 64)
    c1 = jnp.sum(h3 * bands_ref[BOARD_LEN:2 * BOARD_LEN, :], axis=-1)      # (TB, 64)
    cv = jnp.sum(h3 * bands_ref[2 * BOARD_LEN:3 * BOARD_LEN, :], axis=-1)  # (TB, 64)
    cat = jnp.concatenate([c0, c1, cv], axis=-1)                           # (TB, 192)

    # ---- single merged placement matmul + bias (one MXU push) -------------
    b2 = rows2_ref[0:1, :]                                 # (1, 128) bias row
    onehot_v = rows2_ref[1:2, :]                           # (1, 128) one-hot @ 65
    out_lin = jnp.dot(cat, s_ref[...],
                      preferred_element_type=jnp.float32) + b2   # (TB, 128)

    # ---- value epilogue: tanh on TB scalars only, spliced into lane 65 ----
    v_raw = out_lin[:, VAL_LANE:VAL_LANE + 1]              # (TB, 1)
    out_ref[...] = out_lin + (jnp.tanh(v_raw) - v_raw) * onehot_v


# ---------------------------------------------------------------------------
# One-time packing of the PyTorch-style weights into lane-dense kernel inputs.
#
# Raw-view algebra: flat index f = s*65 + c = s*64 + (s + c), so element
# (s, c) of the (64, 65) policy activation lands in row i = s (if s+c <= 63,
# col j = s+c) or row i = s+1 (if s+c >= 64, col j = s+c-64) of the reshaped
# (65, 64) view.  Hence
#   p[i] = sum_c p1[i, c]   * wp2[i+c]      (s+c <= 63)    -> band D0, row i
#        + sum_c p1[i-1, c] * wp2[c+i-65]   (s+c >= 64)    -> band D1, row i-1
# ---------------------------------------------------------------------------
def pack_params(params):
    f32 = jnp.float32
    wp1, bp1 = params["wp1"], params["bp1"]          # (32,65), (1,65)
    wv1, bv1 = params["wv1"], params["bv1"]          # (32,1),  (1,1)
    wp2, bp2 = params["wp2"], params["bp2"]          # (64,1),  (1,1)
    wv2, bv2 = params["wv2"], params["bv2"]          # (64,1),  (1,1)

    # stage-1 fused weights / bias, zero-padded to 128 lanes
    w1 = jnp.zeros((D_MODEL, LANES), f32)
    w1 = w1.at[:, :POL_OUT].set(wp1).at[:, POL_OUT:POL_OUT + 1].set(wv1)
    b1 = jnp.zeros((1, LANES), f32)
    b1 = b1.at[:, :POL_OUT].set(bp1).at[:, POL_OUT:POL_OUT + 1].set(bv1)

    s = jnp.arange(BOARD_LEN)[:, None]               # (64, 1)
    c = jnp.arange(LANES)[None, :]                   # (1, 128)
    wp2v = wp2[:, 0]                                 # (64,)

    # banded stage-2 weights (zero in the value lane and pad lanes),
    # stacked into one (192, 128) operand: [D0; D1; DV]
    d0 = jnp.where(s + c <= BOARD_LEN - 1,
                   wp2v[jnp.clip(s + c, 0, BOARD_LEN - 1)], 0.0)
    d1 = jnp.where((s + c >= BOARD_LEN) & (c <= POL_OUT - 1),
                   wp2v[jnp.clip(s + c - BOARD_LEN, 0, BOARD_LEN - 1)], 0.0)
    dv = jnp.where(c == VAL_LANE, wv2[:, 0:1], 0.0)  # (64, 128)
    bands = jnp.concatenate([d0, d1, dv], axis=0).astype(f32)   # (192, 128)

    # placement matrices, stacked into one (192, 128) operand:
    #   rows   0..63 : c0 -> lane s
    #   rows  64..127: c1 -> lane s+1
    #   rows 128..191: cv -> lane 65 (value)
    s0 = (c == s).astype(f32)                        # (64, 128)
    s1 = (c == s + 1).astype(f32)
    sv = jnp.broadcast_to((c == VAL_LANE).astype(f32), (BOARD_LEN, LANES))
    smat = jnp.concatenate([s0, s1, sv], axis=0).astype(f32)    # (192, 128)

    # row 0: stage-2 bias (bp2 on policy lanes, bv2 on the value lane, 0 pads)
    # row 1: one-hot at the value lane (for the scalar-tanh splice)
    b2 = jnp.where(c < POL_OUT, bp2[0, 0], 0.0)
    b2 = jnp.where(c == VAL_LANE, bv2[0, 0], b2).astype(f32)    # (1, 128)
    onehot_v = (c == VAL_LANE).astype(f32)                      # (1, 128)
    rows2 = jnp.concatenate([b2, onehot_v], axis=0)             # (2, 128)

    return dict(w1=w1, b1=b1, bands=bands, smat=smat, rows2=rows2)


# ---------------------------------------------------------------------------
# Generation-aware batch tiling
# ---------------------------------------------------------------------------
def _num_tensorcores():
    """Best-effort TensorCore-per-chip count (2 on v7x-class, else 1)."""
    try:
        info = pltpu.get_tpu_info()
        for attr in ("num_cores", "core_count", "tensorcores_per_chip"):
            n = getattr(info, attr, None)
            if isinstance(n, int) and n > 0:
                return n
    except Exception:
        pass
    try:
        kind = str(getattr(jax.devices()[0], "device_kind", "")).lower()
        if "v7" in kind or "7x" in kind:
            return 2
    except Exception:
        pass
    return 1


def _pick_tiling(B):
    """Return (TB, G): boards per grid step and number of grid steps."""
    nc = _num_tensorcores()
    if nc <= 1 or B <= 8:
        # single TensorCore (v5e/v6e) or tiny batch: fewest possible steps,
        # exact fit (no padding) whenever B <= TB_CAP.
        TB = min(B, TB_CAP)
    else:
        # 2 TensorCores (v7x): aim for >= nc grid steps so both get work.
        TB = min(TB_CAP, max(8, pl.cdiv(B, nc)))
    if B > TB:
        # tiled case: TB must be a multiple of 8 for dense (unmasked) stores
        TB = min(TB_CAP, ((TB + 7) // 8) * 8)
    G = pl.cdiv(B, TB)
    return TB, G


def policy_value_forward(x, packed, output_softmax=False, batch_tile=None):
    B, L, D = x.shape
    assert L == BOARD_LEN and D == D_MODEL

    if batch_tile is None:
        TB, G = _pick_tiling(B)
    else:
        TB = max(1, min(int(batch_tile), B))
        if TB < B:
            TB = ((TB + 7) // 8) * 8
        G = pl.cdiv(B, TB)
    B_pad = G * TB

    x2 = x.reshape(B * L, D)                              # contiguous, free
    if B_pad != B:
        # TODO(synk): replace tail padding with an in-kernel masked tail block.
        x2 = jnp.pad(x2, ((0, (B_pad - B) * L), (0, 0)))

    out = pl.pallas_call(
        _fused_head_kernel,
        out_shape=jax.ShapeDtypeStruct((B_pad, LANES), jnp.float32),
        grid=(G,),
        in_specs=[
            pl.BlockSpec((TB * L, D), lambda b: (b, 0)),              # x (M-folded)
            pl.BlockSpec((D, LANES), lambda b: (0, 0)),               # w1 packed
            pl.BlockSpec((1, LANES), lambda b: (0, 0)),               # b1 packed
            pl.BlockSpec((3 * BOARD_LEN, LANES), lambda b: (0, 0)),   # [D0;D1;DV]
            pl.BlockSpec((3 * BOARD_LEN, LANES), lambda b: (0, 0)),   # [S0;S1;SV]
            pl.BlockSpec((2, LANES), lambda b: (0, 0)),               # [b2;onehot]
        ],
        out_specs=pl.BlockSpec((TB, LANES), lambda b: (b, 0)),        # lane-dense
        compiler_params=pltpu.CompilerParams(
            dimension_semantics=("parallel",),
            vmem_limit_bytes=32 * 1024 * 1024,
        ),
    )(x2, packed["w1"], packed["b1"], packed["bands"], packed["smat"],
      packed["rows2"])

    out = out[:B]                                         # drop batch padding
    p = out[:, :POL_OUT]                                  # policy logits
    v = out[:, VAL_LANE]                                  # tanh already applied
    if output_softmax:
        p = jax.nn.softmax(p, axis=1)
    return p, v


# ---------------------------------------------------------------------------
# Deterministic parameter init (PyTorch-Linear-style uniform, fixed seed)
# ---------------------------------------------------------------------------
def init_params(key):
    ks = jax.random.split(key, 8)

    def linear(kw, kb, fan_in, fan_out):
        bound = 1.0 / (fan_in ** 0.5)
        w = jax.random.uniform(kw, (fan_in, fan_out), jnp.float32, -bound, bound)
        b = jax.random.uniform(kb, (1, fan_out), jnp.float32, -bound, bound)
        return w, b

    wp1, bp1 = linear(ks[0], ks[1], D_MODEL, POL_OUT)     # policy_layer1
    wp2, bp2 = linear(ks[2], ks[3], BOARD_LEN, 1)         # policy_layer2
    wv1, bv1 = linear(ks[4], ks[5], D_MODEL, VAL_OUT)     # value_layer1
    wv2, bv2 = linear(ks[6], ks[7], BOARD_LEN, 1)         # value_layer2
    return dict(wp1=wp1, bp1=bp1, wp2=wp2, bp2=bp2,
                wv1=wv1, bv1=bv1, wv2=wv2, bv2=bv2)


# ---------------------------------------------------------------------------
# Pure-JAX reference (mirrors the PyTorch forward exactly)
# ---------------------------------------------------------------------------
def ref_forward(x, params, output_softmax=False):
    hp = jax.lax.Precision.HIGHEST
    p = jax.nn.relu(jnp.dot(x, params["wp1"], precision=hp) + params["bp1"])
    p = p.reshape(-1, POL_OUT, BOARD_LEN)                 # raw view
    p = jnp.dot(p, params["wp2"], precision=hp) + params["bp2"]
    p = p.reshape(-1, POL_OUT)
    if output_softmax:
        p = jax.nn.softmax(p, axis=1)
    v = jax.nn.relu(jnp.dot(x, params["wv1"], precision=hp) + params["bv1"])
    v = v.reshape(-1, VAL_OUT, BOARD_LEN)
    v = jnp.dot(v, params["wv2"], precision=hp) + params["bv2"]
    v = jnp.tanh(v.reshape(-1))
    return p, v


if __name__ == "__main__":
    key = jax.random.PRNGKey(0)
    k_x, k_p = jax.random.split(key)

    B = 2
    x = jax.random.normal(k_x, (B, BOARD_LEN, D_MODEL), jnp.float32)
    params = init_params(k_p)
    packed = pack_params(params)

    fwd = jax.jit(policy_value_forward,
                  static_argnames=("output_softmax", "batch_tile"))

    # --- default (single grid step, no padding) path ------------------------
    p_out, v_out = fwd(x, packed, output_softmax=False)
    jax.block_until_ready((p_out, v_out))

    p_ref, v_ref = ref_forward(x, params, output_softmax=False)
    assert p_out.shape == (B, POL_OUT) and v_out.shape == (B,)
    assert jnp.allclose(p_out, p_ref, atol=1e-4, rtol=1e-4), \
        float(jnp.max(jnp.abs(p_out - p_ref)))
    assert jnp.allclose(v_out, v_ref, atol=1e-4, rtol=1e-4), \
        float(jnp.max(jnp.abs(v_out - v_ref)))

    ps_out, _ = fwd(x, packed, output_softmax=True)
    ps_ref, _ = ref_forward(x, params, output_softmax=True)
    assert jnp.allclose(ps_out, ps_ref, atol=1e-4, rtol=1e-4)

    # --- tiled path (multiple grid steps + batch padding) -------------------
    B2 = 20
    x2 = jax.random.normal(jax.random.PRNGKey(1), (B2, BOARD_LEN, D_MODEL),
                           jnp.float32)
    p2_out, v2_out = fwd(x2, packed, output_softmax=False, batch_tile=8)
    jax.block_until_ready((p2_out, v2_out))
    p2_ref, v2_ref = ref_forward(x2, params, output_softmax=False)
    assert jnp.allclose(p2_out, p2_ref, atol=1e-4, rtol=1e-4)
    assert jnp.allclose(v2_out, v2_ref, atol=1e-4, rtol=1e-4)

    print("KERNEL_OK")
</pallas_src>

<mosaic_0001>
module attributes {stable_mosaic.version = 11 : i64} {
  func.func @_fused_head_kernel(%arg0: i32, %arg1: memref<128x32xf32, #tpu.memory_space<vmem>>, %arg2: memref<32x128xf32, #tpu.memory_space<vmem>>, %arg3: memref<1x128xf32, #tpu.memory_space<vmem>>, %arg4: memref<192x128xf32, #tpu.memory_space<vmem>>, %arg5: memref<192x128xf32, #tpu.memory_space<vmem>>, %arg6: memref<2x128xf32, #tpu.memory_space<vmem>>, %arg7: memref<2x128xf32, #tpu.memory_space<vmem>>) attributes {dimension_semantics = [#tpu.dimension_semantics<parallel>], iteration_bounds = array<i64: 1>, scalar_prefetch = 0 : i64, scratch_operands = 0 : i64, tpu.core_type = #tpu.core_type<tc>, window_params = [{transform_indices = @transform_0, window_bounds = array<i64: 128, 32>}, {pipeline_mode = #tpu.pipeline_mode<synchronous>, transform_indices = @transform_1, window_bounds = array<i64: 32, 128>}, {pipeline_mode = #tpu.pipeline_mode<synchronous>, transform_indices = @transform_2, window_bounds = array<i64: 1, 128>}, {pipeline_mode = #tpu.pipeline_mode<synchronous>, transform_indices = @transform_3, window_bounds = array<i64: 192, 128>}, {pipeline_mode = #tpu.pipeline_mode<synchronous>, transform_indices = @transform_4, window_bounds = array<i64: 192, 128>}, {pipeline_mode = #tpu.pipeline_mode<synchronous>, transform_indices = @transform_5, window_bounds = array<i64: 2, 128>}, {transform_indices = @transform_6, window_bounds = array<i64: 2, 128>}]} {
    %c0 = arith.constant 0 : index
    %c0_0 = arith.constant 0 : index
    %0 = vector.load %arg1[%c0, %c0_0] : memref<128x32xf32, #tpu.memory_space<vmem>>, vector<128x32xf32>
    %c0_1 = arith.constant 0 : index
    %c0_2 = arith.constant 0 : index
    %1 = vector.load %arg2[%c0_1, %c0_2] : memref<32x128xf32, #tpu.memory_space<vmem>>, vector<32x128xf32>
    %cst = arith.constant dense<0.000000e+00> : vector<128x128xf32>
    %2 = tpu.matmul %0, %1, %cst {dimension_numbers = #tpu.dot_dimension_numbers<[1], [0], [0], [1], [0, 0, 1, 1], [], []>} : vector<128x32xf32>, vector<32x128xf32>, vector<128x128xf32> -> vector<128x128xf32>
    %c0_3 = arith.constant 0 : index
    %c0_4 = arith.constant 0 : index
    %3 = vector.load %arg3[%c0_3, %c0_4] : memref<1x128xf32, #tpu.memory_space<vmem>>, vector<1x128xf32>
    %4 = vector.broadcast %3 : vector<1x128xf32> to vector<128x128xf32>
    %5 = arith.addf %2, %4 : vector<128x128xf32>
    %cst_5 = arith.constant 0.000000e+00 : f32
    %6 = vector.broadcast %cst_5 : f32 to vector<128x128xf32>
    %7 = arith.maximumf %5, %6 : vector<128x128xf32>
    %8 = vector.shape_cast %7 : vector<128x128xf32> to vector<2x64x128xf32>
    %c0_6 = arith.constant 0 : index
    %c0_7 = arith.constant 0 : index
    %9 = vector.load %arg4[%c0_6, %c0_7] : memref<192x128xf32, #tpu.memory_space<vmem>>, vector<64x128xf32>
    %10 = vector.shape_cast %9 : vector<64x128xf32> to vector<1x64x128xf32>
    %11 = vector.broadcast %10 : vector<1x64x128xf32> to vector<2x64x128xf32>
    %12 = arith.mulf %8, %11 : vector<2x64x128xf32>
    %cst_8 = arith.constant dense<0.000000e+00> : vector<2x64xf32>
    %13 = vector.multi_reduction <add>, %12, %cst_8 [2] : vector<2x64x128xf32> to vector<2x64xf32>
    %c64 = arith.constant 64 : index
    %c0_9 = arith.constant 0 : index
    %14 = vector.load %arg4[%c64, %c0_9] : memref<192x128xf32, #tpu.memory_space<vmem>>, vector<64x128xf32>
    %15 = vector.shape_cast %14 : vector<64x128xf32> to vector<1x64x128xf32>
    %16 = vector.broadcast %15 : vector<1x64x128xf32> to vector<2x64x128xf32>
    %17 = arith.mulf %8, %16 : vector<2x64x128xf32>
    %cst_10 = arith.constant dense<0.000000e+00> : vector<2x64xf32>
    %18 = vector.multi_reduction <add>, %17, %cst_10 [2] : vector<2x64x128xf32> to vector<2x64xf32>
    %c128 = arith.constant 128 : index
    %c0_11 = arith.constant 0 : index
    %19 = vector.load %arg4[%c128, %c0_11] : memref<192x128xf32, #tpu.memory_space<vmem>>, vector<64x128xf32>
    %20 = vector.shape_cast %19 : vector<64x128xf32> to vector<1x64x128xf32>
    %21 = vector.broadcast %20 : vector<1x64x128xf32> to vector<2x64x128xf32>
    %22 = arith.mulf %8, %21 : vector<2x64x128xf32>
    %cst_12 = arith.constant dense<0.000000e+00> : vector<2x64xf32>
    %23 = vector.multi_reduction <add>, %22, %cst_12 [2] : vector<2x64x128xf32> to vector<2x64xf32>
    %24 = tpu.concatenate %13, %18, %23 in 1 : vector<2x64xf32>, vector<2x64xf32>, vector<2x64xf32> -> vector<2x192xf32>
    %c0_13 = arith.constant 0 : index
    %c0_14 = arith.constant 0 : index
    %25 = vector.load %arg6[%c0_13, %c0_14] : memref<2x128xf32, #tpu.memory_space<vmem>>, vector<1x128xf32>
    %c1 = arith.constant 1 : index
    %c0_15 = arith.constant 0 : index
    %26 = vector.load %arg6[%c1, %c0_15] : memref<2x128xf32, #tpu.memory_space<vmem>>, vector<1x128xf32>
    %c0_16 = arith.constant 0 : index
    %c0_17 = arith.constant 0 : index
    %27 = vector.load %arg5[%c0_16, %c0_17] : memref<192x128xf32, #tpu.memory_space<vmem>>, vector<192x128xf32>
    %cst_18 = arith.constant dense<0.000000e+00> : vector<2x128xf32>
    %28 = tpu.matmul %24, %27, %cst_18 {dimension_numbers = #tpu.dot_dimension_numbers<[1], [0], [0], [1], [0, 0, 1, 1], [], []>} : vector<2x192xf32>, vector<192x128xf32>, vector<2x128xf32> -> vector<2x128xf32>
    %29 = vector.broadcast %25 : vector<1x128xf32> to vector<2x128xf32>
    %30 = arith.addf %28, %29 : vector<2x128xf32>
    %31 = vector.extract_strided_slice %30 {offsets = [0, 65], sizes = [2, 1], strides = [1, 1]} : vector<2x128xf32> to vector<2x1xf32>
    %32 = math.tanh %31 : vector<2x1xf32>
    %33 = arith.subf %32, %31 : vector<2x1xf32>
    %34 = vector.broadcast %33 : vector<2x1xf32> to vector<2x128xf32>
    %35 = vector.broadcast %26 : vector<1x128xf32> to vector<2x128xf32>
    %36 = arith.mulf %34, %35 : vector<2x128xf32>
    %37 = arith.addf %30, %36 : vector<2x128xf32>
    %c0_19 = arith.constant 0 : index
    %c0_20 = arith.constant 0 : index
    %38 = vector.load %arg7[%c0_19, %c0_20] : memref<2x128xf32, #tpu.memory_space<vmem>>, vector<2x128xf32>
    tpu.vector_store %arg7[%c0_19, %c0_20], %37 {strides = array<i32>} : memref<2x128xf32, #tpu.memory_space<vmem>>, vector<2x128xf32>,
    return
  }
  func.func @transform_0(%arg0: i32) -> (i32, i32) {
    %c0_i32 = arith.constant 0 : i32
    %c0_i32_0 = arith.constant 0 : i32
    return %arg0, %c0_i32 : i32, i32
  }
  func.func @transform_1(%arg0: i32) -> (i32, i32) {
    %c0_i32 = arith.constant 0 : i32
    %c0_i32_0 = arith.constant 0 : i32
    %c0_i32_1 = arith.constant 0 : i32
    return %c0_i32, %c0_i32_0 : i32, i32
  }
  func.func @transform_2(%arg0: i32) -> (i32, i32) {
    %c0_i32 = arith.constant 0 : i32
    %c0_i32_0 = arith.constant 0 : i32
    %c0_i32_1 = arith.constant 0 : i32
    return %c0_i32, %c0_i32_0 : i32, i32
  }
  func.func @transform_3(%arg0: i32) -> (i32, i32) {
    %c0_i32 = arith.constant 0 : i32
    %c0_i32_0 = arith.constant 0 : i32
    %c0_i32_1 = arith.constant 0 : i32
    return %c0_i32, %c0_i32_0 : i32, i32
  }
  func.func @transform_4(%arg0: i32) -> (i32, i32) {
    %c0_i32 = arith.constant 0 : i32
    %c0_i32_0 = arith.constant 0 : i32
    %c0_i32_1 = arith.constant 0 : i32
    return %c0_i32, %c0_i32_0 : i32, i32
  }
  func.func @transform_5(%arg0: i32) -> (i32, i32) {
    %c0_i32 = arith.constant 0 : i32
    %c0_i32_0 = arith.constant 0 : i32
    %c0_i32_1 = arith.constant 0 : i32
    return %c0_i32, %c0_i32_0 : i32, i32
  }
  func.func @transform_6(%arg0: i32) -> (i32, i32) {
    %c0_i32 = arith.constant 0 : i32
    %c0_i32_0 = arith.constant 0 : i32
    return %arg0, %c0_i32 : i32, i32
  }
}

</mosaic_0001>

<bundles_post_ra>
// kernel: policy_value_forward.1
= control target key start
LH: loop header
LB: loop body
LE: loop exit
PB: predicated region body
PF: predicated region fallthrough
CT: control target
= control target key end

     0   :  { %11 = vsyncpa [#allocation3], 0  ;;  %s1558_s0 = inlined_call_operand.vmem [shape: f32[128,32], index: 0, kind: input, shape index: {}]   ;;  %s1559_s1 = inlined_call_operand.hbm [shape: f32[32,128], index: 1, kind: input, shape index: {}]   ;;  %s1560_s2 = inlined_call_operand.vmem [shape: f32[1,128], index: 2, kind: input, shape index: {}]   ;;  %s1561_s3 = inlined_call_operand.vmem [shape: f32[192,128], index: 3, kind: input, shape index: {}]   ;;  %s1562_s4 = inlined_call_operand.hbm [shape: f32[192,128], index: 4, kind: input, shape index: {}]   ;;  %s1563_s5 = inlined_call_operand.vmem [shape: f32[2,128], index: 5, kind: input, shape index: {}]   ;;  %s1564_s6 = inlined_call_operand.vmem [shape: f32[2,128], index: 6, kind: output, shape index: {}]  }
   0x1   :  { %12 = vsyncpa [#allocation5], 0  ;;  %s1072_s21 = smov [#allocation2]   ;;  %s1024_s25 = scalar_lea.hbm %s1559_s1, 512 }
   0x2   :  { %s20_s22 = sshll.u32 %s1072_s21, 4  ;;  %p1025_p0 = scmp.ne.s32.totalorder %s1559_s1, %s1024_s25  ;;  %s21_s22 = int_to_ptr.vmem [resolvable:$true] %s20_s22 }
   0x3   :  { %p1028_p1 = scmp.lt.u32.totalorder %s1024_s25, %s1559_s1 }
   0x5   :  { %p1030_p2 = pnand %p1028_p1, %p1025_p0 }
   0x7   :  { %1033 = shalt.err (!%p1030_p2)
}
   0x8   :  { %s1034_s30 = scalar_lea.vmem %s21_s22, 512  ;;  %p1039_p4 = scmp.lt.s32.totalorder %s21_s22, %s21_s22 }
   0x9   :  { %p1035_p3 = scmp.ne.s32.totalorder %s21_s22, %s1034_s30  ;;  %p1040_p5 = scmp.lt.s32.totalorder %s1034_s30, %s1034_s30 }
   0xb   :  { %p1041_p6 = por %p1040_p5, %p1039_p4 }
   0xd   :  { %p1042_p7 = pnand %p1041_p6, %p1035_p3 }
   0xf   :  { %1045 = shalt.err (!%p1042_p7)
}
  0x10   :  { %s1073_s7 = smov 128   ;;  %s1074_s8 = smov 8  }
  0x11   :  { %26 = dma.hbm_to_vmem [thread:$0]  %s1559_s1, 512, %s21_s22, [#allocation3], %s1073_s7, %s1073_s7, %s1074_s8  }
  0x12   :  { %s1075_s11 = smov [#allocation4]   ;;  %s1046_s15 = scalar_lea.hbm %s1562_s4, 3072 }
  0x13   :  { %s36_s12 = sshll.u32 %s1075_s11, 4  ;;  %p1047_p8 = scmp.ne.s32.totalorder %s1562_s4, %s1046_s15  ;;  %s37_s12 = int_to_ptr.vmem [resolvable:$true] %s36_s12 }
  0x14   :  { %p1050_p9 = scmp.lt.u32.totalorder %s1046_s15, %s1562_s4 }
  0x16   :  { %p1052_p10 = pnand %p1050_p9, %p1047_p8 }
  0x18   :  { %1055 = shalt.err (!%p1052_p10)
}
  0x19   :  { %s1056_s20 = scalar_lea.vmem %s37_s12, 3072  ;;  %p1061_p12 = scmp.lt.s32.totalorder %s37_s12, %s37_s12 }
  0x1a   :  { %p1057_p11 = scmp.ne.s32.totalorder %s37_s12, %s1056_s20  ;;  %p1062_p13 = scmp.lt.s32.totalorder %s1056_s20, %s1056_s20 }
  0x1c   :  { %p1063_p0 = por %p1062_p13, %p1061_p12 }
  0x1e   :  { %p1064_p1 = pnand %p1063_p0, %p1057_p11 }
  0x20   :  { %1067 = shalt.err (!%p1064_p1)
}
  0x21   :  { %42 = dma.hbm_to_vmem [thread:$0]  %s1562_s4, 3072, %s37_s12, [#allocation5], %s1073_s7, %s1073_s7, %s1074_s8  }
  0x22   :  { %1068 = dma.done.wait [#allocation3], 512  }
  0x23   :  { %1069 = vsyncadd [#allocation3], 4294966784 }
  0x24   :  { %1070 = dma.done.wait [#allocation5], 3072  }
  0x25   :  { %1071 = vsyncadd [#allocation5], 4294964224  ;;  %vm78_vm0 = vcmask 261120   ;;  %v67_v0 = vld [vmem:[#allocation2] sm:$0xff]  ;;  %v68_v1 = vld [vmem:[#allocation2 + $0x8] sm:$0xff]  ;;  %vm483_vm1 = vcmask 130112  }
  0x26   :  { %v69_v2 = vld [vmem:[#allocation2 + $0x10] sm:$0xff]  ;;  %v971_v3 = vpack.c.bf16 %v68_v1, %v67_v0  ;;  %v70_v4 = vld [vmem:[#allocation2 + $0x18] sm:$0xff]  ;;  %v51_v5 = vld [vmem:[%s1558_s0] sm:$0xff]  ;;  %vm595_vm2 = vcmask 654912   ;;  %vm490_vm3 = vcmask 195712   ;;  %vm497_vm4 = vcmask 261312  }
  0x27   :  { %v975_v6 = vpack.c.bf16 %v70_v4, %v69_v2  ;;  %947 = vmatprep.mubr.msk.f32.mxu0 %vm78_vm0, %v51_v5  ;;  %v52_v7 = vld [vmem:[%s1558_s0 + $0x8] sm:$0xff]  ;;  %v53_v8 = vld [vmem:[%s1558_s0 + $0x10] sm:$0xff]  ;;  %v54_v9 = vld [vmem:[%s1558_s0 + $0x18] sm:$0xff]  ;;  %vm602_vm5 = vcmask 720512   ;;  %vm609_vm6 = vcmask 786112   ;;  %vm504_vm7 = vcmask 326912  }
  0x28   :  { %972 = vmatprep.subr.bf16.mxu0 %v971_v3  ;;  %v55_v10 = vld [vmem:[%s1558_s0 + $0x20] sm:$0xff]  ;;  %v56_v11 = vld [vmem:[%s1558_s0 + $0x28] sm:$0xff]  ;;  %v57_v12 = vld [vmem:[%s1558_s0 + $0x30] sm:$0xff]  ;;  %vm616_vm8 = vcmask 851712   ;;  %vm511_vm9 = vcmask 392512   ;;  %vm518_vm10 = vcmask 458112  }
  0x29   :  { %974 = vmatpush3.bf16.msra.mxu0 %v971_v3  ;;  %v58_v13 = vld [vmem:[%s1558_s0 + $0x38] sm:$0xff]  ;;  %v59_v14 = vld [vmem:[%s1558_s0 + $0x40] sm:$0xff]  ;;  %v60_v15 = vld [vmem:[%s1558_s0 + $0x48] sm:$0xff]  ;;  %vm623_vm11 = vcmask 917312   ;;  %vm630_vm12 = vcmask 982912   ;;  %vm525_vm13 = vcmask 523712  }
  0x2a   :  { %976 = vmatprep.subr.bf16.mxu0 %v975_v6  ;;  %v61_v16 = vld [vmem:[%s1558_s0 + $0x50] sm:$0xff]  ;;  %v62_v17 = vld [vmem:[%s1558_s0 + $0x58] sm:$0xff]  ;;  %v63_v18 = vld [vmem:[%s1558_s0 + $0x60] sm:$0xff]  ;;  %vm637_vm14 = vcmask 1048512   ;;  %vm566_vm15 = vcmask 1041409  }
  0x2b   :  { %v64_v19 = vld [vmem:[%s1558_s0 + $0x68] sm:$0xff]  ;;  %v65_v20 = vld [vmem:[%s1558_s0 + $0x70] sm:$0xff]  ;;  %v66_v21 = vld [vmem:[%s1558_s0 + $0x78] sm:$0xff] }
  0x2c   :  { %v1204_v22 = vld [vmem:[%s1560_s2] ss:$0 sm:$0xff]  ;;  %v345_v27 = vld [vmem:[%s1561_s3 + $0x48] sm:$0xff]  ;;  %v291_v55 = vld [vmem:[%s1561_s3 + $0x18] sm:$0xff] }
  0x2d   :  { %978 = vmatpush3.bf16.msra.mxu0 %v975_v6  ;;  %v289_v28 = vld [vmem:[%s1561_s3 + $0x8] sm:$0xff]  ;;  %v288_v36 = vld [vmem:[%s1561_s3] sm:$0xff]  ;;  %v347_v62 = vld [vmem:[%s1561_s3 + $0x58] sm:$0xff] }
  0x2e   :  { %v401_v35 = vld [vmem:[%s1561_s3 + $0x88] sm:$0xff]  ;;  %v344_v41 = vld [vmem:[%s1561_s3 + $0x40] sm:$0xff]  ;;  %v403_v6 = vld [vmem:[%s1561_s3 + $0x98] sm:$0xff] }
  0x2f   :  { %v400_v48 = vld [vmem:[%s1561_s3 + $0x80] sm:$0xff] }
  0x30   :  { %948 = vmatmul.mubr.msk.f32.vlgmr.msra.gmra.mrb[0].mxu0 %vm78_vm0, %v52_v7 }
  0x31   :  { %950 = vmatprep.mubr.msk.f32.mxu0 %vm78_vm0, %v53_v8 }
  0x34   :  { %951 = vmatmul.mubr.msk.f32.gmra.mrb[2].mxu0 %vm78_vm0, %v54_v9 }
  0x35   :  { %953 = vmatprep.mubr.msk.f32.mxu0 %vm78_vm0, %v55_v10 }
  0x38   :  { %954 = vmatmul.mubr.msk.f32.gmra.mrb[4].mxu0 %vm78_vm0, %v56_v11 }
  0x39   :  { %956 = vmatprep.mubr.msk.f32.mxu0 %vm78_vm0, %v57_v12 }
  0x3c   :  { %957 = vmatmul.mubr.msk.f32.gmra.mrb[6].mxu0 %vm78_vm0, %v58_v13 }
  0x3d   :  { %959 = vmatprep.mubr.msk.f32.mxu0 %vm78_vm0, %v59_v14 }
  0x40   :  { %960 = vmatmul.mubr.msk.f32.gmra.mrb[8].mxu0 %vm78_vm0, %v60_v15  ;;  %v290_v15 = vld [vmem:[%s1561_s3 + $0x10] sm:$0xff] }
  0x41   :  { %962 = vmatprep.mubr.msk.f32.mxu0 %vm78_vm0, %v61_v16 }
  0x44   :  { %963 = vmatmul.mubr.msk.f32.gmra.mrb[10].mxu0 %vm78_vm0, %v62_v17 }
  0x45   :  { %965 = vmatprep.mubr.msk.f32.mxu0 %vm78_vm0, %v63_v18 }
  0x48   :  { %966 = vmatmul.mubr.msk.f32.gmra.mrb[12].mxu0 %vm78_vm0, %v64_v19 }
  0x49   :  { %968 = vmatprep.mubr.msk.f32.mxu0 %vm78_vm0, %v65_v20  ;;  %v346_v20 = vld [vmem:[%s1561_s3 + $0x50] sm:$0xff] }
  0x4c   :  { %969 = vmatmul.mubr.msk.f32.gmra.mrb[14].mxu0 %vm78_vm0, %v66_v21  ;;  %vm775_vm0 = vcmask 523264  }
 0x103   :  { %v949_v23 = vpop.f32.mrb[0].mxu0 }
 0x104   :  { %v199_v24 = vadd.f32 %v949_v23, %v1204_v22  ;;  %v193_v25 = vpop.f32.mrb[1].mxu0 }
 0x105   :  { %v194_v26 = vadd.f32 %v1204_v22, %v193_v25  ;;  %v402_v25 = vld [vmem:[%s1561_s3 + $0x90] sm:$0xff] }
 0x106   :  { %v273_v29 = vmax.f32 %v199_v24, 0.0 }
 0x107   :  { %v952_v30 = vpop.f32.mrb[2].mxu0  ;;  %v272_v31 = vmax.f32 %v194_v26, 0.0 }
 0x108   :  { %v203_v32 = vpop.f32.mrb[3].mxu0  ;;  %v353_v33 = vmul.f32 %v345_v27, %v273_v29  ;;  %v297_v34 = vmul.f32 %v289_v28, %v273_v29  ;;  %v409_v39 = vmul.f32 %v401_v35, %v273_v29  ;;  %v209_v43 = vadd.f32 %v952_v30, %v1204_v22  ;;  %v293_v30 = vld [vmem:[%s1561_s3 + $0x28] sm:$0xff] }
 0x109   :  { %v296_v40 = vmul.f32 %v288_v36, %v272_v31  ;;  %v352_v46 = vmul.f32 %v344_v41, %v272_v31  ;;  %v408_v53 = vmul.f32 %v400_v48, %v272_v31  ;;  %v204_v2 = vadd.f32 %v1204_v22, %v203_v32 }
 0x10a   :  { %370 = vadd.xlane.f32.xlu1 %v353_v33  ;;  %314 = vadd.xlane.f32.xlu0 %v297_v34  ;;  %v275_v50 = vmax.f32 %v209_v43, 0.0  ;;  %v349_v34 = vld [vmem:[%s1561_s3 + $0x68] sm:$0xff] }
 0x10b   :  { %v955_v37 = vpop.f32.mrb[4].mxu0  ;;  %v274_v10 = vmax.f32 %v204_v2, 0.0 }
 0x10c   :  { %v1220_v38 = vpop.f32.mrb[5].mxu0  ;;  %v299_v60 = vmul.f32 %v291_v55, %v275_v50  ;;  %v355_v4 = vmul.f32 %v347_v62, %v275_v50  ;;  %v411_v12 = vmul.f32 %v403_v6, %v275_v50  ;;  %v219_v23 = vadd.f32 %v955_v37, %v1204_v22 }
 0x10d   :  { %v298_v19 = vmul.f32 %v290_v15, %v274_v10  ;;  %v354_v24 = vmul.f32 %v346_v20, %v274_v10  ;;  %v410_v29 = vmul.f32 %v402_v25, %v274_v10 }
 0x10e   :  { %426 = vadd.xlane.f32.xlu1 %v409_v39  ;;  %312 = vadd.xlane.f32.xlu0 %v296_v40  ;;  %v277_v26 = vmax.f32 %v219_v23, 0.0  ;;  %v405_v39 = vld [vmem:[%s1561_s3 + $0xa8] sm:$0xff] }
 0x10f   :  { %v958_v42 = vpop.f32.mrb[6].mxu0 }
 0x110   :  { %v1227_v44 = vadd.f32 %v958_v42, %v1204_v22  ;;  %v223_v45 = vpop.f32.mrb[7].mxu0  ;;  %v301_v33 = vmul.f32 %v293_v30, %v277_v26  ;;  %v357_v37 = vmul.f32 %v349_v34, %v277_v26  ;;  %v413_v43 = vmul.f32 %v405_v39, %v277_v26  ;;  %v788_v26 = vld [vmem:[#allocation4 + $0x48] sm:$0xff] }
 0x111   :  { %v1230_v47 = vadd.f32 %v1204_v22, %v223_v45  ;;  %v292_v45 = vld [vmem:[%s1561_s3 + $0x20] sm:$0xff] }
 0x112   :  { %368 = vadd.xlane.f32.xlu0 %v352_v46 }
 0x113   :  { %v961_v49 = vpop.f32.mrb[8].mxu0 }
 0x114   :  { %v239_v51 = vadd.f32 %v961_v49, %v1204_v22  ;;  %v233_v52 = vpop.f32.mrb[9].mxu0  ;;  %v348_v49 = vld [vmem:[%s1561_s3 + $0x60] sm:$0xff] }
 0x115   :  { %v234_v54 = vadd.f32 %v1204_v22, %v233_v52  ;;  %v1294_v52 = vmax.f32 %v1227_v44, 0.0  ;;  %v294_v44 = vld [vmem:[%s1561_s3 + $0x30] sm:$0xff] }
 0x116   :  { %v281_v56 = vmax.f32 %v239_v51, 0.0  ;;  %424 = vadd.xlane.f32.xlu0 %v408_v53  ;;  %v404_v51 = vld [vmem:[%s1561_s3 + $0xa0] sm:$0xff] }
 0x117   :  { %v280_v57 = vmax.f32 %v234_v54, 0.0  ;;  %v964_v58 = vpop.f32.mrb[10].mxu0 }
 0x118   :  { %v305_v59 = vmul.f32 %v289_v28, %v281_v56  ;;  %v243_v61 = vpop.f32.mrb[11].mxu0  ;;  %v361_v3 = vmul.f32 %v345_v27, %v281_v56  ;;  %v249_v8 = vadd.f32 %v964_v58, %v1204_v22  ;;  %v417_v11 = vmul.f32 %v401_v35, %v281_v56 }
 0x119   :  { %v1243_v63 = vmul.f32 %v344_v41, %v280_v57  ;;  %v1245_v0 = vmul.f32 %v400_v48, %v280_v57  ;;  %v304_v18 = vmul.f32 %v288_v36, %v280_v57  ;;  %v244_v27 = vadd.f32 %v1204_v22, %v243_v61 }
 0x11a   :  { %330 = vadd.xlane.f32.xlu1 %v305_v59  ;;  %318 = vadd.xlane.f32.xlu0 %v299_v60  ;;  %v283_v17 = vmax.f32 %v249_v8, 0.0  ;;  %v214_v35 = vadd.f32 %v1204_v22, %v1220_v38  ;;  %v278_v56 = vmax.f32 %v1230_v47, 0.0  ;;  %v779_v47 = vld [vmem:[#allocation4] sm:$0xff]  ;;  %v781_v8 = vld [vmem:[#allocation4 + $0x10] sm:$0xff] }
 0x11b   :  { %v967_v1 = vpop.f32.mrb[12].mxu0  ;;  %v282_v31 = vmax.f32 %v244_v27, 0.0 }
 0x11c   :  { %v253_v5 = vpop.f32.mrb[13].mxu0  ;;  %v307_v21 = vmul.f32 %v291_v55, %v283_v17  ;;  %v363_v28 = vmul.f32 %v347_v62, %v283_v17  ;;  %v419_v32 = vmul.f32 %v403_v6, %v283_v17  ;;  %v259_v40 = vadd.f32 %v967_v1, %v1204_v22  ;;  %v295_v55 = vld [vmem:[%s1561_s3 + $0x38] sm:$0xff]  ;;  %v350_v62 = vld [vmem:[%s1561_s3 + $0x70] sm:$0xff]  ;;  %v780_v1 = vld [vmem:[#allocation4 + $0x8] sm:$0xff] }
 0x11d   :  { %v1252_v7 = vadd.f32 %v1204_v22, %v253_v5  ;;  %v306_v36 = vmul.f32 %v290_v15, %v282_v31  ;;  %v276_v41 = vmax.f32 %v214_v35, 0.0  ;;  %v362_v42 = vmul.f32 %v346_v20, %v282_v31  ;;  %v406_v5 = vld [vmem:[%s1561_s3 + $0xb0] sm:$0xff]  ;;  %v783_v15 = vld [vmem:[#allocation4 + $0x20] sm:$0xff]  ;;  %v784_v17 = vld [vmem:[#allocation4 + $0x28] sm:$0xff] }
 0x11e   :  { %386 = vadd.xlane.f32.xlu1 %v361_v3  ;;  %374 = vadd.xlane.f32.xlu0 %v355_v4  ;;  %v285_v46 = vmax.f32 %v259_v40, 0.0  ;;  %v418_v38 = vmul.f32 %v402_v25, %v282_v31  ;;  %v303_v59 = vmul.f32 %v295_v55, %v1294_v52  ;;  %v302_v61 = vmul.f32 %v294_v44, %v278_v56  ;;  %v786_v20 = vld [vmem:[#allocation4 + $0x38] sm:$0xff]  ;;  %v787_v25 = vld [vmem:[#allocation4 + $0x40] sm:$0xff] }
 0x11f   :  { %v970_v9 = vpop.f32.mrb[14].mxu0  ;;  %v300_v48 = vmul.f32 %v292_v45, %v276_v41  ;;  %v412_v54 = vmul.f32 %v404_v51, %v276_v41  ;;  %v284_v57 = vmax.f32 %v1252_v7, 0.0  ;;  %v358_v3 = vmul.f32 %v350_v62, %v278_v56 }
 0x120   :  { %v1256_v13 = vadd.f32 %v970_v9, %v1204_v22  ;;  %v263_v14 = vpop.f32.mrb[15].mxu0  ;;  %v309_v50 = vmul.f32 %v293_v30, %v285_v46  ;;  %v365_v53 = vmul.f32 %v349_v34, %v285_v46  ;;  %v421_v58 = vmul.f32 %v405_v39, %v285_v46  ;;  %v782_v9 = vld [vmem:[#allocation4 + $0x18] sm:$0xff]  ;;  %v792_v34 = vld [vmem:[#allocation4 + $0x68] sm:$0xff]  ;;  %v797_v46 = vld [vmem:[#allocation4 + $0x90] sm:$0xff] }
 0x121   :  { %v1262_v16 = vadd.f32 %v1204_v22, %v263_v14  ;;  %v356_v22 = vmul.f32 %v348_v49, %v276_v41  ;;  %v308_v60 = vmul.f32 %v292_v45, %v284_v57  ;;  %v364_v2 = vmul.f32 %v348_v49, %v284_v57  ;;  %v790_v30 = vld [vmem:[#allocation4 + $0x58] sm:$0xff]  ;;  %v799_v49 = vld [vmem:[#allocation4 + $0xa0] sm:$0xff] }
 0x122   :  { %442 = vadd.xlane.f32.xlu1 %v417_v11  ;;  %430 = vadd.xlane.f32.xlu0 %v411_v12  ;;  %v980_v4 = vpack.c.bf16 %v780_v1, %v779_v47  ;;  %v1076_v6 = vmov 0.0|0.0   ;;  %v287_v7 = vmax.f32 %v1256_v13, 0.0  ;;  %v420_v10 = vmul.f32 %v404_v51, %v284_v57  ;;  %v351_v13 = vld [vmem:[%s1561_s3 + $0x78] sm:$0xff]  ;;  %v801_v51 = vld [vmem:[#allocation4 + $0xb0] sm:$0xff] }
 0x123   :  { %979 = vmatprep.subr.bf16.mxu1 %v1076_v6  ;;  %v414_v11 = vmul.f32 %v406_v5, %v278_v56  ;;  %v983_v12 = vpack.c.bf16 %v782_v9, %v781_v8  ;;  %v359_v27 = vmul.f32 %v351_v13, %v1294_v52  ;;  %v794_v39 = vld [vmem:[#allocation4 + $0x78] sm:$0xff] }
 0x124   :  { %981 = vmatpush1.bf16.msra.mxu1 %v980_v4  ;;  %v311_v14 = vmul.f32 %v295_v55, %v287_v7  ;;  %v367_v23 = vmul.f32 %v351_v13, %v287_v7 }
 0x125   :  { %982 = vmatprep.subr.bf16.mxu1 %v1076_v6 }
 0x126   :  { %328 = vadd.xlane.f32.xlu1 %v304_v18  ;;  %316 = vadd.xlane.f32.xlu0 %v298_v19  ;;  %v986_v18 = vpack.c.bf16 %v784_v17, %v783_v15  ;;  %v785_v19 = vld [vmem:[#allocation4 + $0x30] sm:$0xff] }
 0x128   :  { %984 = vmatpush1.bf16.msra.mxu1 %v983_v12 }
 0x129   :  { %985 = vmatprep.subr.bf16.mxu1 %v1076_v6 }
 0x12a   :  { %334 = vadd.xlane.f32.xlu1 %v307_v21  ;;  %372 = vadd.xlane.f32.xlu0 %v354_v24  ;;  %v286_v21 = vmax.f32 %v1262_v16, 0.0  ;;  %v989_v24 = vpack.c.bf16 %v786_v20, %v785_v19  ;;  %v407_v16 = vld [vmem:[%s1561_s3 + $0xb8] sm:$0xff] }
 0x12b   :  { %v423_v40 = vmul.f32 %v407_v16, %v287_v7 }
 0x12c   :  { %987 = vmatpush1.bf16.msra.mxu1 %v986_v18  ;;  %v366_v31 = vmul.f32 %v350_v62, %v286_v21  ;;  %v422_v35 = vmul.f32 %v406_v5, %v286_v21 }
 0x12d   :  { %988 = vmatprep.subr.bf16.mxu1 %v1076_v6 }
 0x12e   :  { %390 = vadd.xlane.f32.xlu1 %v363_v28  ;;  %428 = vadd.xlane.f32.xlu0 %v410_v29  ;;  %v992_v28 = vpack.c.bf16 %v788_v26, %v787_v25  ;;  %v789_v29 = vld [vmem:[#allocation4 + $0x50] sm:$0xff] }
 0x130   :  { %990 = vmatpush1.bf16.msra.mxu1 %v989_v24 }
 0x131   :  { %991 = vmatprep.subr.bf16.mxu1 %v1076_v6 }
 0x132   :  { %446 = vadd.xlane.f32.xlu1 %v419_v32  ;;  %322 = vadd.xlane.f32.xlu0 %v301_v33  ;;  %v995_v32 = vpack.c.bf16 %v790_v30, %v789_v29  ;;  %v791_v33 = vld [vmem:[#allocation4 + $0x60] sm:$0xff] }
 0x134   :  { %993 = vmatpush1.bf16.msra.mxu1 %v992_v28 }
 0x135   :  { %994 = vmatprep.subr.bf16.mxu1 %v1076_v6 }
 0x136   :  { %332 = vadd.xlane.f32.xlu1 %v306_v36  ;;  %378 = vadd.xlane.f32.xlu0 %v357_v37  ;;  %v998_v36 = vpack.c.bf16 %v792_v34, %v791_v33  ;;  %v793_v37 = vld [vmem:[#allocation4 + $0x70] sm:$0xff] }
 0x137   :  { %v1001_v41 = vpack.c.bf16 %v794_v39, %v793_v37 }
 0x138   :  { %996 = vmatpush1.bf16.msra.mxu1 %v995_v32 }
 0x139   :  { %997 = vmatprep.subr.bf16.mxu1 %v1076_v6 }
 0x13a   :  { %388 = vadd.xlane.f32.xlu1 %v362_v42  ;;  %434 = vadd.xlane.f32.xlu0 %v413_v43  ;;  %v795_v42 = vld [vmem:[#allocation4 + $0x80] sm:$0xff]  ;;  %v796_v43 = vld [vmem:[#allocation4 + $0x88] sm:$0xff] }
 0x13b   :  { %v1004_v45 = vpack.c.bf16 %v796_v43, %v795_v42 }
 0x13c   :  { %999 = vmatpush1.bf16.msra.mxu1 %v998_v36 }
 0x13d   :  { %1000 = vmatprep.subr.bf16.mxu1 %v1076_v6 }
 0x13e   :  { %444 = vadd.xlane.f32.xlu1 %v418_v38  ;;  %320 = vadd.xlane.f32.xlu0 %v300_v48  ;;  %v798_v38 = vld [vmem:[#allocation4 + $0x98] sm:$0xff] }
 0x13f   :  { %v1007_v48 = vpack.c.bf16 %v798_v38, %v797_v46 }
 0x140   :  { %1002 = vmatpush1.bf16.msra.mxu1 %v1001_v41 }
 0x141   :  { %1003 = vmatprep.subr.bf16.mxu1 %v1076_v6 }
 0x142   :  { %338 = vadd.xlane.f32.xlu1 %v309_v50  ;;  %376 = vadd.xlane.f32.xlu0 %v356_v22  ;;  %v800_v50 = vld [vmem:[#allocation4 + $0xa8] sm:$0xff] }
 0x143   :  { %v1010_v22 = vpack.c.bf16 %v800_v50, %v799_v49 }
 0x144   :  { %1005 = vmatpush1.bf16.msra.mxu1 %v1004_v45 }
 0x145   :  { %1006 = vmatprep.subr.bf16.mxu1 %v1076_v6 }
 0x146   :  { %394 = vadd.xlane.f32.xlu1 %v365_v53  ;;  %432 = vadd.xlane.f32.xlu0 %v412_v54  ;;  %v472_v54 = vlaneseq }
 0x148   :  { %1008 = vmatpush1.bf16.msra.mxu1 %v1007_v48  ;;  %v1335_v55 = vand.u32 127, %v472_v54  ;;  %v1337_v56 = vshrl.u32 %v472_v54, 7 }
 0x149   :  { %1009 = vmatprep.subr.bf16.mxu1 %v1076_v6 }
 0x14a   :  { %450 = vadd.xlane.f32.xlu1 %v421_v58  ;;  %326 = vadd.xlane.f32.xlu0 %v303_v59  ;;  %v478_v57 = vadd.s32 4294967288, %v1335_v55  ;;  %v590_v59 = vadd.s32 4294967224, %v1335_v55  ;;  %v485_v20 = vadd.s32 4294967280, %v1335_v55  ;;  %v597_v25 = vadd.s32 4294967216, %v1335_v55 }
 0x14c   :  { %1011 = vmatpush1.bf16.msra.mxu1 %v1010_v22  ;;  %v1350_v1 = vsub.s32 %v590_v59, %v1337_v56  ;;  %v1372_v26 = vsub.s32 %v485_v20, %v1337_v56  ;;  %v1379_v29 = vsub.s32 %v597_v25, %v1337_v56  ;;  %v611_v25 = vadd.s32 4294967200, %v1335_v55 }
 0x14d   :  { %1012 = vmatprep.subr.bf16.mxu1 %v1076_v6 }
 0x14e   :  { %336 = vadd.xlane.f32.xlu1 %v308_v60  ;;  %324 = vadd.xlane.f32.xlu0 %v302_v61  ;;  %v1346_v60 = vsub.s32 %v1335_v55, %v1337_v56  ;;  %v585_v61 = vadd.s32 4294967232, %v1335_v55 }
 0x150   :  { %v1355_v4 = vsub.s32 %v585_v61, %v1337_v56 }
 0x152   :  { %392 = vadd.xlane.f32.xlu1 %v364_v2  ;;  %380 = vadd.xlane.f32.xlu0 %v358_v3 }
 0x156   :  { %448 = vadd.xlane.f32.xlu1 %v420_v10  ;;  %436 = vadd.xlane.f32.xlu0 %v414_v11 }
 0x15a   :  { %342 = vadd.xlane.f32.xlu1 %v311_v14  ;;  %384 = vadd.xlane.f32.xlu0 %v1243_v63  ;;  %v310_v63 = vmul.f32 %v294_v44, %v286_v21  ;;  %v1342_v44 = vsub.s32 %v478_v57, %v1337_v56  ;;  %v492_v21 = vadd.s32 4294967272, %v1335_v55 }
 0x15e   :  { %398 = vadd.xlane.f32.xlu1 %v367_v23  ;;  %440 = vadd.xlane.f32.xlu0 %v1245_v0  ;;  %v415_v0 = vmul.f32 %v407_v16, %v1294_v52  ;;  %v802_v52 = vld [vmem:[#allocation4 + $0xb8] sm:$0xff] }
 0x15f   :  { %v1013_v53 = vpack.c.bf16 %v802_v52, %v801_v51 }
 0x161   :  { %1014 = vmatpush1.bf16.msra.mxu1 %v1013_v53 }
 0x162   :  { %340 = vadd.xlane.f32.xlu1 %v310_v63  ;;  %382 = vadd.xlane.f32.xlu0 %v359_v27  ;;  %v1375_v63 = vsub.s32 %v492_v21, %v1337_v56  ;;  %v604_v27 = vadd.s32 4294967208, %v1335_v55 }
 0x164   :  { %v1386_v33 = vsub.s32 %v604_v27, %v1337_v56  ;;  %v520_v27 = vadd.s32 4294967240, %v1335_v55 }
 0x166   :  { %396 = vadd.xlane.f32.xlu1 %v366_v31  ;;  %438 = vadd.xlane.f32.xlu0 %v415_v0 }
 0x16a   :  { %452 = vadd.xlane.f32.xlu1 %v422_v35 }
 0x16e   :  { %454 = vadd.xlane.f32.xlu1 %v423_v40 }
 0x197   :  { %v315_v58 = vpop.xlane.xlu0 %314  ;;  %v371_v62 = vpop.xlane.xlu1 %370 }
 0x198   :  { %v482_v2 = vrot.slane %v315_v58, %v1342_v44  ;;  %v594_v7 = vrot.slane %v371_v62, %v1350_v1 }
 0x19b   :  { %v313_v47 = vpop.xlane.xlu0 %312  ;;  %v427_v9 = vpop.xlane.xlu1 %426 }
 0x19c   :  { %v477_v3 = vrot.slane %v313_v47, %v1346_v60  ;;  %v703_v12 = vrot.slane %v427_v9, %v1342_v44 }
 0x19e   :  { %v484_v5 = vsel %vm483_vm1, %v482_v2, %v477_v3 }
 0x19f   :  { %v369_v6 = vpop.xlane.xlu0 %368 }
 0x1a0   :  { %v589_v8 = vrot.slane %v369_v6, %v1355_v4 }
 0x1a2   :  { %v596_v10 = vsel %vm595_vm2, %v594_v7, %v589_v8 }
 0x1a3   :  { %v425_v11 = vpop.xlane.xlu0 %424 }
 0x1a4   :  { %v699_v14 = vrot.slane %v425_v11, %v1346_v60 }
 0x1a6   :  { %v704_v15 = vsel %vm483_vm1, %v703_v12, %v699_v14 }
 0x1a7   :  { %v331_v17 = vpop.xlane.xlu1 %330  ;;  %v319_v18 = vpop.xlane.xlu0 %318 }
 0x1a8   :  { %v534_v30 = vrot.slane %v331_v17, %v1342_v44  ;;  %v496_v32 = vrot.slane %v319_v18, %v1375_v63  ;;  %v506_v17 = vadd.s32 4294967256, %v1335_v55  ;;  %v618_v18 = vadd.s32 4294967192, %v1335_v55 }
 0x1ab   :  { %v1364_v13 = vpop.xlane.xlu1 %386  ;;  %v375_v19 = vpop.xlane.xlu0 %374 }
 0x1ac   :  { %v608_v41 = vrot.slane %v375_v19, %v1386_v33 }
 0x1af   :  { %v1368_v23 = vpop.xlane.xlu1 %442  ;;  %v431_v24 = vpop.xlane.xlu0 %430 }
 0x1b0   :  { %v713_v48 = vrot.slane %v431_v24, %v1375_v63  ;;  %v513_v24 = vadd.s32 4294967248, %v1335_v55 }
 0x1b3   :  { %v329_v28 = vpop.xlane.xlu1 %328  ;;  %v317_v16 = vpop.xlane.xlu0 %316 }
 0x1b4   :  { %v530_v31 = vrot.slane %v329_v28, %v1346_v60  ;;  %v489_v0 = vrot.slane %v317_v16, %v1372_v26  ;;  %v1451_v28 = vsub.s32 %v506_v17, %v1337_v56  ;;  %v1454_v16 = vsub.s32 %v618_v18, %v1337_v56 }
 0x1b6   :  { %v535_v34 = vsel %vm483_vm1, %v534_v30, %v530_v31  ;;  %v491_v35 = vsel %vm490_vm3, %v489_v0, %v484_v5  ;;  %v625_v30 = vadd.s32 4294967184, %v1335_v55 }
 0x1b7   :  { %v335_v36 = vpop.xlane.xlu1 %334  ;;  %v373_v37 = vpop.xlane.xlu0 %372  ;;  %v1391_v39 = vsel %vm497_vm4, %v496_v32, %v491_v35  ;;  %v632_v32 = vadd.s32 4294967176, %v1335_v55 }
 0x1b8   :  { %v601_v40 = vrot.slane %v373_v37, %v1379_v29  ;;  %v544_v57 = vrot.slane %v335_v36, %v1375_v63  ;;  %v1462_v36 = vsub.s32 %v513_v24, %v1337_v56 }
 0x1ba   :  { %v603_v42 = vsel %vm602_vm5, %v601_v40, %v596_v10  ;;  %v614_v40 = vsub.s32 %v611_v25, %v1337_v56 }
 0x1bb   :  { %v1396_v43 = vpop.xlane.xlu1 %390  ;;  %v429_v45 = vpop.xlane.xlu0 %428  ;;  %v1399_v46 = vsel %vm609_vm6, %v608_v41, %v603_v42  ;;  %v1467_v41 = vsub.s32 %v520_v27, %v1337_v56 }
 0x1bc   :  { %v708_v38 = vrot.slane %v429_v45, %v1372_v26 }
 0x1be   :  { %v709_v49 = vsel %vm490_vm3, %v708_v38, %v704_v15  ;;  %v499_v15 = vadd.s32 4294967264, %v1335_v55 }
 0x1bf   :  { %v1404_v50 = vpop.xlane.xlu1 %446  ;;  %v1406_v22 = vpop.xlane.xlu0 %322  ;;  %v1409_v51 = vsel %vm497_vm4, %v713_v48, %v709_v49 }
 0x1c0   :  { %v1445_v21 = vsub.s32 %v499_v15, %v1337_v56  ;;  %v752_v27 = vrot.slane %v1404_v50, %v1375_v63 }
 0x1c3   :  { %v333_v52 = vpop.xlane.xlu1 %332  ;;  %v1411_v53 = vpop.xlane.xlu0 %378 }
 0x1c4   :  { %v539_v54 = vrot.slane %v333_v52, %v1372_v26 }
 0x1c6   :  { %v540_v58 = vsel %vm490_vm3, %v539_v54, %v535_v34  ;;  %v646_v34 = vrot.slane %v1364_v13, %v1350_v1  ;;  %v628_v13 = vsub.s32 %v625_v30, %v1337_v56  ;;  %v656_v54 = vrot.slane %v1396_v43, %v1386_v33 }
 0x1c7   :  { %v389_v59 = vpop.xlane.xlu1 %388  ;;  %v1416_v61 = vpop.xlane.xlu0 %434  ;;  %v545_v62 = vsel %vm497_vm4, %v544_v57, %v540_v58  ;;  %v510_v57 = vrot.slane %v1406_v22, %v1451_v28  ;;  %v742_v58 = vrot.slane %v1368_v23, %v1342_v44 }
 0x1c8   :  { %v651_v42 = vrot.slane %v389_v59, %v1379_v29 }
 0x1cb   :  { %v1419_v47 = vpop.xlane.xlu1 %444  ;;  %v321_v2 = vpop.xlane.xlu0 %320 }
 0x1cc   :  { %v503_v35 = vrot.slane %v321_v2, %v1445_v21 }
 0x1ce   :  { %v505_v48 = vsel %vm504_vm7, %v503_v35, %v1391_v39  ;;  %v622_v39 = vrot.slane %v1411_v53, %v1454_v16 }
 0x1cf   :  { %v1421_v3 = vpop.xlane.xlu1 %338  ;;  %v1423_v5 = vpop.xlane.xlu0 %376  ;;  %v512_v43 = vsel %vm511_vm9, %v510_v57, %v505_v48 }
 0x1d0   :  { %v554_v33 = vrot.slane %v1421_v3, %v1451_v28 }
 0x1d3   :  { %v1425_v6 = vpop.xlane.xlu1 %394  ;;  %v1427_v7 = vpop.xlane.xlu0 %432 }
 0x1d7   :  { %v1429_v8 = vpop.xlane.xlu1 %450  ;;  %v1431_v9 = vpop.xlane.xlu0 %326 }
 0x1db   :  { %v337_v10 = vpop.xlane.xlu1 %336  ;;  %v325_v11 = vpop.xlane.xlu0 %324 }
 0x1dc   :  { %v549_v55 = vrot.slane %v337_v10, %v1445_v21  ;;  %v517_v49 = vrot.slane %v325_v11, %v1462_v36  ;;  %v666_v11 = vrot.slane %v1425_v6, %v1454_v16  ;;  %v718_v6 = vrot.slane %v1427_v7, %v1445_v21 }
 0x1de   :  { %v550_v59 = vsel %vm504_vm7, %v549_v55, %v545_v62 }
 0x1df   :  { %v1433_v12 = vpop.xlane.xlu1 %392  ;;  %v1435_v14 = vpop.xlane.xlu0 %380  ;;  %v555_v10 = vsel %vm511_vm9, %v554_v33, %v550_v59  ;;  %v918_v59 = vld [vmem:[%s1563_s5 + $0x1] ss:$0 sm:$0xff] }
 0x1e0   :  { %v661_v44 = vrot.slane %v1433_v12, %v614_v40  ;;  %v629_v12 = vrot.slane %v1435_v14, %v628_v13 }
 0x1e3   :  { %v1440_v19 = vpop.xlane.xlu1 %448  ;;  %v1442_v20 = vpop.xlane.xlu0 %436 }
 0x1e4   :  { %v757_v63 = vrot.slane %v1440_v19, %v1445_v21  ;;  %v723_v21 = vrot.slane %v1416_v61, %v1451_v28 }
 0x1e7   :  { %v343_v31 = vpop.xlane.xlu1 %342  ;;  %v385_v0 = vpop.xlane.xlu0 %384 }
 0x1e8   :  { %v642_v37 = vrot.slane %v385_v0, %v1355_v4  ;;  %v635_v4 = vsub.s32 %v632_v32, %v1337_v56  ;;  %v615_v56 = vrot.slane %v1423_v5, %v614_v40  ;;  %v519_v5 = vsel %vm518_vm10, %v517_v49, %v512_v43 }
 0x1e9   :  { %v564_v3 = vrot.slane %v343_v31, %v1467_v41 }
 0x1ea   :  { %v647_v1 = vsel %vm595_vm2, %v646_v34, %v642_v37 }
 0x1eb   :  { %v399_v45 = vpop.xlane.xlu1 %398  ;;  %v441_v38 = vpop.xlane.xlu0 %440  ;;  %v652_v29 = vsel %vm602_vm5, %v651_v42, %v647_v1  ;;  %v719_v42 = vsel %vm504_vm7, %v718_v6, %v1409_v51  ;;  %v728_v1 = vrot.slane %v1442_v20, %v1462_v36 }
 0x1ec   :  { %v738_v52 = vrot.slane %v441_v38, %v1346_v60  ;;  %v747_v60 = vrot.slane %v1419_v47, %v1372_v26  ;;  %v657_v22 = vsel %vm609_vm6, %v656_v54, %v652_v29  ;;  %v617_v26 = vsel %vm616_vm8, %v615_v56, %v1399_v46 }
 0x1ed   :  { %v524_v47 = vrot.slane %v1431_v9, %v1467_v41  ;;  %v662_v17 = vsel %vm616_vm8, %v661_v44, %v657_v22  ;;  %v624_v30 = vsel %vm623_vm11, %v622_v39, %v617_v26  ;;  %v676_v31 = vrot.slane %v399_v45, %v635_v4 }
 0x1ee   :  { %v743_v23 = vsel %vm483_vm1, %v742_v58, %v738_v52  ;;  %v667_v0 = vsel %vm623_vm11, %v666_v11, %v662_v17  ;;  %v631_v32 = vsel %vm630_vm12, %v629_v12, %v624_v30  ;;  %v762_v45 = vrot.slane %v1429_v8, %v1451_v28  ;;  %v916_v28 = vld [vmem:[%s1563_s5] ss:$0 sm:$0xff] }
 0x1ef   :  { %v341_v2 = vpop.xlane.xlu1 %340  ;;  %v383_v62 = vpop.xlane.xlu0 %382  ;;  %v748_v18 = vsel %vm490_vm3, %v747_v60, %v743_v23  ;;  %v526_v25 = vsel %vm525_vm13, %v524_v47, %v519_v5  ;;  %v724_v49 = vsel %vm511_vm9, %v723_v21, %v719_v42  ;;  %v1077_v8 = vmov 65  }
 0x1f0   :  { %v559_v53 = vrot.slane %v341_v2, %v1462_v36  ;;  %v636_v24 = vrot.slane %v383_v62, %v635_v4  ;;  %v753_v34 = vsel %vm497_vm4, %v752_v27, %v748_v18  ;;  %1021 = vset.pattern.permute.xlu0 %v1077_v8 }
 0x1f1   :  { %v758_v4 = vsel %vm504_vm7, %v757_v63, %v753_v34 }
 0x1f2   :  { %v560_v15 = vsel %vm518_vm10, %v559_v53, %v555_v10  ;;  %v638_v50 = vsel %vm637_vm14, %v636_v24, %v631_v32  ;;  %v763_v20 = vsel %vm511_vm9, %v762_v45, %v758_v4 }
 0x1f3   :  { %v397_v46 = vpop.xlane.xlu1 %396  ;;  %v565_v9 = vsel %vm525_vm13, %v564_v3, %v560_v15  ;;  %v439_v7 = vpop.xlane.xlu0 %438 }
 0x1f4   :  { %v671_v16 = vrot.slane %v397_v46, %v628_v13  ;;  %v567_v14 = vsel %vm566_vm15, %v565_v9, %v526_v25  ;;  %v733_v38 = vrot.slane %v439_v7, %v1467_v41 }
 0x1f6   :  { %v672_v35 = vsel %vm630_vm12, %v671_v16, %v667_v0 }
 0x1f7   :  { %v453_v37 = vpop.xlane.xlu1 %452  ;;  %v677_v40 = vsel %vm637_vm14, %v676_v31, %v672_v35 }
 0x1f8   :  { %v678_v55 = vsel %vm566_vm15, %v677_v40, %v638_v50  ;;  %v767_v13 = vrot.slane %v453_v37, %v1462_v36  ;;  %v729_v36 = vsel %vm518_vm10, %v728_v1, %v724_v49 }
 0x1f9   :  { %v776_v19 = vsel %vm775_vm0, %v567_v14, %v678_v55  ;;  %v734_v52 = vsel %vm525_vm13, %v733_v38, %v729_v36 }
 0x1fa   :  { %v768_v29 = vsel %vm518_vm10, %v767_v13, %v763_v20 }
 0x1fb   :  { %v455_v51 = vpop.xlane.xlu1 %454 }
 0x1fc   :  { %v772_v48 = vrot.slane %v455_v51, %v1467_v41 }
 0x1fe   :  { %v773_v61 = vsel %vm525_vm13, %v772_v48, %v768_v29 }
 0x1ff   :  { %v774_v54 = vsel %vm566_vm15, %v773_v61, %v734_v52 }
 0x200   :  { %917 = vmatprep.mubr.msk.f32.mxu1 %vm775_vm0, %v774_v54 }
 0x201   :  { %874 = vmatmul.mubr.f32.vlgmr.msra.gmra.mrb[0].mxu1 %v776_v19 }
 0x2d4   :  { %v875_v41 = vpop.f32.mrb[0].mxu1 }
 0x2d5   :  { %v876_v57 = vadd.f32 %v916_v28, %v875_v41  ;;  %v877_v56 = vpop.f32.mrb[1].mxu1 }
 0x2d7   :  { %1022 = vtanh.f32 %v876_v57 }
 0x2e1   :  { %v1023_v58 = vpop.eup %1022 }
 0x2e2   :  { %v880_v39 = vsub.f32 %v1023_v58, %v876_v57 }
 0x2e4   :  { %883 = vperm.xlu0 %1021, %v880_v39  }
 0x363   :  { %v884_v60 = vpop.permute.xlu0 %883 }
 0x364   :  { %v890_v33 = vmul.f32 %v918_v59, %v884_v60 }
 0x366   :  { %v891_v43 = vadd.f32 %v890_v33, %v876_v57 }
 0x368   :  { %892 = vst [vmem:[%s1564_s6] sm:$0x3] %v891_v43 }
 0x369   :  { %897 = vsyncpa [#allocation3], 1 }
 0x36a   :  { %898 = vsyncpa [#allocation5], 1 }

</bundles_post_ra>
